<compile_context>
chip_gen: v7x
topology: tpu7x:2x2x1
jax: 0.10.0
libtpu: 0.0.40
codegen_flags: <defaults>
</compile_context>

<pallas_src>
import functools

import jax
import jax.numpy as jnp
from jax.experimental import pallas as pl
from jax.experimental.pallas import tpu as pltpu


def _mdn_kernel(xT_ref, w_in_ref, b_in_ref, w_heads_ref, b_heads_ref,
                out_ref, *, n_comp):
    """fc_in -> tanh -> fused 3-head matmul -> {id, exp, softmax} on one tile."""
    C = n_comp
    hp = jax.lax.Precision.HIGHEST

    xT = xT_ref[...]                                                  # (D_in, TB)

    # fc_in + tanh (batch on the lane axis).
    act = jnp.tanh(
        jnp.dot(w_in_ref[...], xT, precision=hp,
                preferred_element_type=jnp.float32) + b_in_ref[...])  # (H, TB)

    # One fused head matmul: rows [0:C]=mu, [C:2C]=log sigma, [2C:3C]=alpha.
    fused = (jnp.dot(w_heads_ref[...], act, precision=hp,
                     preferred_element_type=jnp.float32)
             + b_heads_ref[...])                                      # (3C, TB)

    # Row-range selection via full-tile masks (VPU) instead of non-sublane-
    # aligned slices + concatenate: avoids XLU relayouts and an extra (3C, TB)
    # copy, and finishes with a single whole-tile store.
    rows = jax.lax.broadcasted_iota(jnp.int32, fused.shape, 0)        # (3C, TB)
    is_sigma = jnp.logical_and(rows >= C, rows < 2 * C)
    is_alpha = rows >= 2 * C

    # Numerically-stable softmax restricted to the alpha rows (per column).
    alpha_logits = jnp.where(is_alpha, fused, -jnp.inf)
    m = jnp.max(alpha_logits, axis=0, keepdims=True)                  # (1, TB)
    e = jnp.where(is_alpha, jnp.exp(fused - m), 0.0)                  # (3C, TB)
    den = jnp.sum(e, axis=0, keepdims=True)                           # (1, TB)
    # EXACT reciprocal (approx=False default): alpha rows sum to 1 to f32 ulp.
    alpha = e * pl.reciprocal(den)

    out = jnp.where(is_sigma, jnp.exp(fused), fused)   # sigma rows: exp; mu: id
    out = jnp.where(is_alpha, alpha, out)
    out_ref[...] = out


def _num_tensorcores():
    """Best-effort TensorCores-per-chip (v7x: 2, v5e/v6e: 1). Tiling hint only."""
    try:
        info = pltpu.get_tpu_info()
    except Exception:
        return 1
    for attr in ("num_cores", "core_count", "num_tensorcores", "tensorcore_count"):
        n = getattr(info, attr, None)
        if isinstance(n, int) and 0 < n <= 16:
            return n
    return 1


def _choose_tiling(B, tile_cap, num_cores):
    """Pick (tile_b, padded_B).

    * Tiny batches: one full-width tile, zero padding.
    * Otherwise: enough tiles that (a) every TensorCore gets work (v7x has 2
      per chip; v5e/v6e get no artificial split) and (b) no tile exceeds
      `tile_cap` lanes. Tiles are rounded up to a multiple of 128 lanes, so
      padding waste is bounded to <128 rows/tile instead of up to a full tile.
    """
    if B <= max(256, 128 * num_cores):
        return B, B
    n_tiles = max(num_cores, int(pl.cdiv(B, tile_cap)))
    tb = int(pl.cdiv(int(pl.cdiv(B, n_tiles)), 128)) * 128
    return tb, int(pl.cdiv(B, tb)) * tb


@functools.partial(jax.jit, static_argnames=("tile_b", "num_cores"))
def mdn_forward(x, params, *, tile_b=16384, num_cores=None):
    """UnivariateMogMDN forward pass in one Pallas kernel.

    x: (B, ndim_input) float32.
    params: PyTorch-layout weights: w_* of shape (out, in), b_* of shape (out,).
    Returns (mu, sigma, alpha), each (B, n_components) float32.
    """
    B, d_in = x.shape
    H = params["w_in"].shape[0]
    C = params["w_mu"].shape[0]

    if num_cores is None:
        num_cores = _num_tensorcores()

    # Fuse the three heads into one weight/bias (row order: mu, sigma, alpha).
    w_heads = jnp.concatenate(
        [params["w_mu"], params["w_sigma"], params["w_alpha"]], axis=0)   # (3C, H)
    b_heads = jnp.concatenate(
        [params["b_mu"], params["b_sigma"], params["b_alpha"]],
        axis=0).reshape(3 * C, 1)                                         # (3C, 1)
    w_in = params["w_in"]                                                 # (H, D_in)
    b_in = params["b_in"].reshape(H, 1)                                   # (H, 1)

    tb, B_pad = _choose_tiling(B, tile_b, num_cores)
    grid = (B_pad // tb,)

    # Transposed input (batch on the lane axis): one pad+transpose pass, with
    # padding bounded by _choose_tiling.
    x_t = jnp.pad(x, ((0, B_pad - B), (0, 0))).T                          # (D_in, B_pad)

    # Weights/biases: full-array blocks with constant index_maps (no per-step
    # refetch); x/out tiled along the lane (batch) axis only.
    in_specs = [
        pl.BlockSpec((d_in, tb), lambda i: (0, i)),
        pl.BlockSpec((H, d_in), lambda i: (0, 0)),
        pl.BlockSpec((H, 1), lambda i: (0, 0)),
        pl.BlockSpec((3 * C, H), lambda i: (0, 0)),
        pl.BlockSpec((3 * C, 1), lambda i: (0, 0)),
    ]
    out_spec = pl.BlockSpec((3 * C, tb), lambda i: (0, i))

    # Advisory cost: tiny-compute, memory-bound custom call.
    flops = (2 * d_in * H + 2 * H * 3 * C + 12 * C) * B_pad
    transcendentals = (H + 4 * C) * B_pad
    bytes_accessed = (d_in + 3 * C) * 4 * B_pad

    fused = pl.pallas_call(
        functools.partial(_mdn_kernel, n_comp=C),
        grid_spec=pltpu.PrefetchScalarGridSpec(
            num_scalar_prefetch=0,
            grid=grid,
            in_specs=in_specs,
            out_specs=out_spec,
        ),
        out_shape=jax.ShapeDtypeStruct((3 * C, B_pad), jnp.float32),
        compiler_params=pltpu.CompilerParams(
            dimension_semantics=("parallel",)),
        cost_estimate=pl.CostEstimate(
            flops=flops,
            transcendentals=transcendentals,
            bytes_accessed=bytes_accessed),
    )(x_t, w_in, b_in, w_heads, b_heads)

    # Single slice+transpose pass over the fused output; mu/sigma/alpha are
    # cheap column slices of that one pass (instead of 3 slice+transpose ops).
    fused_bt = fused[:, :B].T                                             # (B, 3C)
    mu = fused_bt[:, 0:C]
    sigma = fused_bt[:, C:2 * C]
    alpha = fused_bt[:, 2 * C:3 * C]
    return mu, sigma, alpha


def init_params(key, ndim_input=2, n_hidden=5, n_components=3):
    """Synthetic init mimicking nn.Linear's U(-1/sqrt(fan_in), +1/sqrt(fan_in)).

    Weights are stored in PyTorch (out_features, in_features) layout.
    """
    def linear(k, fan_in, fan_out):
        kw, kb = jax.random.split(k)
        bound = 1.0 / jnp.sqrt(jnp.float32(fan_in))
        w = jax.random.uniform(kw, (fan_out, fan_in), jnp.float32, -bound, bound)
        b = jax.random.uniform(kb, (fan_out,), jnp.float32, -bound, bound)
        return w, b

    k1, k2, k3, k4 = jax.random.split(key, 4)
    w_in, b_in = linear(k1, ndim_input, n_hidden)
    w_a, b_a = linear(k2, n_hidden, n_components)
    w_s, b_s = linear(k3, n_hidden, n_components)
    w_m, b_m = linear(k4, n_hidden, n_components)
    return {
        "w_in": w_in, "b_in": b_in,
        "w_alpha": w_a, "b_alpha": b_a,
        "w_sigma": w_s, "b_sigma": b_s,
        "w_mu": w_m, "b_mu": b_m,
    }


def mdn_forward_ref(x, p):
    """Pure-JAX reference (PyTorch semantics) for correctness checking."""
    hp = jax.lax.Precision.HIGHEST
    act = jnp.tanh(jnp.dot(x, p["w_in"].T, precision=hp) + p["b_in"])
    alpha = jax.nn.softmax(jnp.dot(act, p["w_alpha"].T, precision=hp)
                           + p["b_alpha"], axis=1)
    sigma = jnp.exp(jnp.dot(act, p["w_sigma"].T, precision=hp) + p["b_sigma"])
    mu = jnp.dot(act, p["w_mu"].T, precision=hp) + p["b_mu"]
    return mu, sigma, alpha


def _check(x, params, n_components, **kwargs):
    mu, sigma, alpha = mdn_forward(x, params, **kwargs)
    jax.block_until_ready((mu, sigma, alpha))
    mu_r, sigma_r, alpha_r = mdn_forward_ref(x, params)

    B = x.shape[0]
    assert mu.shape == (B, n_components)
    assert sigma.shape == (B, n_components)
    assert alpha.shape == (B, n_components)
    assert jnp.allclose(mu, mu_r, atol=1e-5, rtol=1e-4)
    assert jnp.allclose(sigma, sigma_r, atol=1e-5, rtol=1e-4)
    assert jnp.allclose(alpha, alpha_r, atol=1e-5, rtol=1e-4)
    # Exact (non-approx) softmax normalization: rows sum to 1 within f32 ulp.
    assert jnp.allclose(jnp.sum(alpha, axis=1), jnp.ones((B,)), atol=1e-5)


if __name__ == "__main__":
    key = jax.random.PRNGKey(0)
    k_param, k_x1, k_x2, k_x3 = jax.random.split(key, 4)

    ndim_input, n_hidden, n_components = 2, 5, 3
    params = init_params(k_param, ndim_input, n_hidden, n_components)

    # Tiny batch: single full-width tile, grid=(1,), zero padding.
    x_small = jax.random.normal(k_x1, (8, ndim_input), jnp.float32)
    _check(x_small, params, n_components)

    # Ragged medium batch: tile rounded up to a multiple of 128 lanes.
    x_med = jax.random.normal(k_x2, (1000, ndim_input), jnp.float32)
    _check(x_med, params, n_components)

    # Multi-tile path: explicit small tile cap -> grid > 1 ("parallel") with
    # a bounded padded tail.
    x_big = jax.random.normal(k_x3, (4000, ndim_input), jnp.float32)
    _check(x_big, params, n_components, tile_b=1024)

    # TODO(synk): loss()/predict() (PytorchUnivariateMoG pdf/sampling) are
    # host-side utilities outside the forward pass and are not implemented here.
    print("KERNEL_OK")
</pallas_src>

<mosaic_0001>
module attributes {stable_mosaic.version = 11 : i64} {
  func.func @_mdn_kernel(%arg0: i32, %arg1: memref<2x8xf32, #tpu.memory_space<vmem>>, %arg2: memref<5x2xf32, #tpu.memory_space<vmem>>, %arg3: memref<5x1xf32, #tpu.memory_space<vmem>>, %arg4: memref<9x5xf32, #tpu.memory_space<vmem>>, %arg5: memref<9x1xf32, #tpu.memory_space<vmem>>, %arg6: memref<9x8xf32, #tpu.memory_space<vmem>>) attributes {dimension_semantics = [#tpu.dimension_semantics<parallel>], iteration_bounds = array<i64: 1>, scalar_prefetch = 0 : i64, scratch_operands = 0 : i64, tpu.core_type = #tpu.core_type<tc>, window_params = [{transform_indices = @transform_0, window_bounds = array<i64: 2, 8>}, {pipeline_mode = #tpu.pipeline_mode<synchronous>, transform_indices = @transform_1, window_bounds = array<i64: 5, 2>}, {pipeline_mode = #tpu.pipeline_mode<synchronous>, transform_indices = @transform_2, window_bounds = array<i64: 5, 1>}, {pipeline_mode = #tpu.pipeline_mode<synchronous>, transform_indices = @transform_3, window_bounds = array<i64: 9, 5>}, {pipeline_mode = #tpu.pipeline_mode<synchronous>, transform_indices = @transform_4, window_bounds = array<i64: 9, 1>}, {transform_indices = @transform_5, window_bounds = array<i64: 9, 8>}]} {
    %c0 = arith.constant 0 : index
    %c0_0 = arith.constant 0 : index
    %0 = vector.load %arg1[%c0, %c0_0] : memref<2x8xf32, #tpu.memory_space<vmem>>, vector<2x8xf32>
    %c0_1 = arith.constant 0 : index
    %c0_2 = arith.constant 0 : index
    %1 = vector.load %arg2[%c0_1, %c0_2] : memref<5x2xf32, #tpu.memory_space<vmem>>, vector<5x2xf32>
    %cst = arith.constant dense<0.000000e+00> : vector<5x8xf32>
    %2 = tpu.matmul %1, %0, %cst {dimension_numbers = #tpu.dot_dimension_numbers<[1], [0], [0], [1], [0, 0, 1, 1], [], []>, precision = #tpu.contract_precision<fp32>} : vector<5x2xf32>, vector<2x8xf32>, vector<5x8xf32> -> vector<5x8xf32>
    %c0_3 = arith.constant 0 : index
    %c0_4 = arith.constant 0 : index
    %3 = vector.load %arg3[%c0_3, %c0_4] : memref<5x1xf32, #tpu.memory_space<vmem>>, vector<5x1xf32>
    %4 = vector.broadcast %3 : vector<5x1xf32> to vector<5x8xf32>
    %5 = arith.addf %2, %4 : vector<5x8xf32>
    %6 = math.tanh %5 : vector<5x8xf32>
    %c0_5 = arith.constant 0 : index
    %c0_6 = arith.constant 0 : index
    %7 = vector.load %arg4[%c0_5, %c0_6] : memref<9x5xf32, #tpu.memory_space<vmem>>, vector<9x5xf32>
    %cst_7 = arith.constant dense<0.000000e+00> : vector<9x8xf32>
    %8 = tpu.matmul %7, %6, %cst_7 {dimension_numbers = #tpu.dot_dimension_numbers<[1], [0], [0], [1], [0, 0, 1, 1], [], []>, precision = #tpu.contract_precision<fp32>} : vector<9x5xf32>, vector<5x8xf32>, vector<9x8xf32> -> vector<9x8xf32>
    %c0_8 = arith.constant 0 : index
    %c0_9 = arith.constant 0 : index
    %9 = vector.load %arg5[%c0_8, %c0_9] : memref<9x1xf32, #tpu.memory_space<vmem>>, vector<9x1xf32>
    %10 = vector.broadcast %9 : vector<9x1xf32> to vector<9x8xf32>
    %11 = arith.addf %8, %10 : vector<9x8xf32>
    %12 = tpu.iota {dimensions = array<i32: 0>} : vector<9x8xi32>
    %c3_i32 = arith.constant 3 : i32
    %13 = vector.broadcast %c3_i32 : i32 to vector<9x8xi32>
    %14 = arith.cmpi sge, %12, %13 : vector<9x8xi32>
    %c6_i32 = arith.constant 6 : i32
    %15 = vector.broadcast %c6_i32 : i32 to vector<9x8xi32>
    %16 = arith.cmpi slt, %12, %15 : vector<9x8xi32>
    %17 = arith.andi %14, %16 : vector<9x8xi1>
    %c6_i32_10 = arith.constant 6 : i32
    %18 = vector.broadcast %c6_i32_10 : i32 to vector<9x8xi32>
    %19 = arith.cmpi sge, %12, %18 : vector<9x8xi32>
    %cst_11 = arith.constant 0xFF800000 : f32
    %20 = vector.broadcast %cst_11 : f32 to vector<9x8xf32>
    %21 = arith.select %19, %11, %20 : vector<9x8xi1>, vector<9x8xf32>
    %cst_12 = arith.constant dense<0xFF800000> : vector<8xf32>
    %22 = vector.multi_reduction <maximumf>, %21, %cst_12 [0] : vector<9x8xf32> to vector<8xf32>
    %23 = vector.shape_cast %22 : vector<8xf32> to vector<1x8xf32>
    %24 = vector.broadcast %23 : vector<1x8xf32> to vector<9x8xf32>
    %25 = arith.subf %11, %24 : vector<9x8xf32>
    %26 = math.exp %25 : vector<9x8xf32>
    %cst_13 = arith.constant 0.000000e+00 : f32
    %27 = vector.broadcast %cst_13 : f32 to vector<9x8xf32>
    %28 = arith.select %19, %26, %27 : vector<9x8xi1>, vector<9x8xf32>
    %cst_14 = arith.constant dense<0.000000e+00> : vector<8xf32>
    %29 = vector.multi_reduction <add>, %28, %cst_14 [0] : vector<9x8xf32> to vector<8xf32>
    %30 = vector.shape_cast %29 : vector<8xf32> to vector<1x8xf32>
    %31 = tpu.reciprocal %30 : vector<1x8xf32> -> vector<1x8xf32>
    %32 = vector.broadcast %31 : vector<1x8xf32> to vector<9x8xf32>
    %33 = arith.mulf %28, %32 : vector<9x8xf32>
    %34 = math.exp %11 : vector<9x8xf32>
    %35 = arith.select %17, %34, %11 : vector<9x8xi1>, vector<9x8xf32>
    %36 = arith.select %19, %33, %35 : vector<9x8xi1>, vector<9x8xf32>
    %c0_15 = arith.constant 0 : index
    %c0_16 = arith.constant 0 : index
    %37 = vector.load %arg6[%c0_15, %c0_16] : memref<9x8xf32, #tpu.memory_space<vmem>>, vector<9x8xf32>
    tpu.vector_store %arg6[%c0_15, %c0_16], %36 {strides = array<i32>} : memref<9x8xf32, #tpu.memory_space<vmem>>, vector<9x8xf32>,
    return
  }
  func.func @transform_0(%arg0: i32) -> (i32, i32) {
    %c0_i32 = arith.constant 0 : i32
    %c0_i32_0 = arith.constant 0 : i32
    return %c0_i32, %arg0 : i32, i32
  }
  func.func @transform_1(%arg0: i32) -> (i32, i32) {
    %c0_i32 = arith.constant 0 : i32
    %c0_i32_0 = arith.constant 0 : i32
    %c0_i32_1 = arith.constant 0 : i32
    return %c0_i32, %c0_i32_0 : i32, i32
  }
  func.func @transform_2(%arg0: i32) -> (i32, i32) {
    %c0_i32 = arith.constant 0 : i32
    %c0_i32_0 = arith.constant 0 : i32
    %c0_i32_1 = arith.constant 0 : i32
    return %c0_i32, %c0_i32_0 : i32, i32
  }
  func.func @transform_3(%arg0: i32) -> (i32, i32) {
    %c0_i32 = arith.constant 0 : i32
    %c0_i32_0 = arith.constant 0 : i32
    %c0_i32_1 = arith.constant 0 : i32
    return %c0_i32, %c0_i32_0 : i32, i32
  }
  func.func @transform_4(%arg0: i32) -> (i32, i32) {
    %c0_i32 = arith.constant 0 : i32
    %c0_i32_0 = arith.constant 0 : i32
    %c0_i32_1 = arith.constant 0 : i32
    return %c0_i32, %c0_i32_0 : i32, i32
  }
  func.func @transform_5(%arg0: i32) -> (i32, i32) {
    %c0_i32 = arith.constant 0 : i32
    %c0_i32_0 = arith.constant 0 : i32
    return %c0_i32, %arg0 : i32, i32
  }
}

</mosaic_0001>

<bundles_post_ra>
// kernel: mdn_forward.1
= control target key start
LH: loop header
LB: loop body
LE: loop exit
PB: predicated region body
PF: predicated region fallthrough
CT: control target
= control target key end

     0   :  { %vm32_vm0 = vcmask 1041408   ;;  %vm28_vm1 = vcmask 15360   ;;  %v1183_v0 = vmov 0.0   ;;  %vm1184_vm2 = vmmov 0   ;;  %s1258_s0 = inlined_call_operand.vmem [shape: f32[2,8], index: 0, kind: input, shape index: {}]   ;;  %s1259_s1 = inlined_call_operand.vmem [shape: f32[5,2], index: 1, kind: input, shape index: {}]   ;;  %s1260_s2 = inlined_call_operand.vmem [shape: f32[5,1], index: 2, kind: input, shape index: {}]   ;;  %s1261_s4 = inlined_call_operand.vmem [shape: f32[9,1], index: 4, kind: input, shape index: {}]   ;;  %s1262_s3 = inlined_call_operand.vmem [shape: f32[9,5], index: 3, kind: input, shape index: {}]   ;;  %s1263_s5 = inlined_call_operand.vmem [shape: f32[9,8], index: 5, kind: output, shape index: {}]  }
   0x1   :  { %1085 = vmatprep.subr.mxu0 %v1183_v0  ;;  %v20_v1 = vld [vmem:[%s1258_s0] sm:$0x3]  ;;  %1087 = vmatprep.mubr.msk.f32.mxu0 %vm1184_vm2, %v1183_v0  ;;  %v1185_v5 = vmov 0   ;;  %vm497_vm3 = vcmask 39936   ;;  %v484_v19 = vld [vmem:[%s1262_s3 + $0x8] sm:$0x1]  ;;  %v997_v44 = vlaneseq }
   0x2   :  { %v21_v2 = vld [vmem:[%s1259_s1] sm:$0x1f]  ;;  %v34_v3 = vsel %vm32_vm0, %v20_v1, 0  ;;  %1171 = vset.pattern.permute.xlu0 %v1185_v5  ;;  %1172 = vset.pattern.permute.xlu1 %v1185_v5  ;;  %v502_v21 = vsel %vm497_vm3, %v484_v19, 0  ;;  %v486_v27 = vld [vmem:[%s1261_s4 + $0x8] sm:$0x1] }
   0x3   :  { %v30_v4 = vsel %vm28_vm1, %v21_v2, 0  ;;  %v22_v6 = vld [vmem:[%s1260_s2] sm:$0x1f]  ;;  %v37_v7 = vand.u32 4294901760, %v34_v3  ;;  %494 = vperm.xlu1 %1172, %v486_v27   ;;  %v584_v28 = vand.u32 4294901760, %v502_v21  ;;  %vm504_vm4 = vcmask 1044480  }
   0x4   :  { %v102_v8 = vand.u32 4294901760, %v30_v4  ;;  %25 = vperm.xlu0 %1171, %v22_v6   ;;  %v485_v9 = vld [vmem:[%s1261_s4] sm:$0xff]  ;;  %v998_v45 = vshrl.u32 %v997_v44, 7  ;;  %vm1012_vm6 = vcmask 57344   ;;  %vm1010_vm7 = vcmask 64512  }
   0x5   :  { %1086 = vmatpush3.msra.mxu0 %v37_v7  ;;  %v114_v10 = vsub.f32 %v34_v3, %v37_v7  ;;  %v483_v18 = vld [vmem:[%s1262_s3] sm:$0xff]  ;;  %v585_v33 = vsub.f32 %v502_v21, %v584_v28 }
   0x6   :  { %v103_v11 = vsub.f32 %v30_v4, %v102_v8  ;;  %1090 = vmatprep.subr.mxu0 %v1183_v0  ;;  %v499_v20 = vsel %vm497_vm3, %v483_v18, 0  ;;  %vm1006_vm5 = vcmp.ge.s32.totalorder %v998_v45, 6  ;;  %vm1000_vm8 = vcmp.ge.s32.totalorder %v998_v45, 3 }
   0x7   :  { %v115_v13 = vand.u32 4294901760, %v114_v10  ;;  %v574_v22 = vand.u32 4294901760, %v499_v20  ;;  %v586_v34 = vand.u32 4294901760, %v585_v33  ;;  %vm1002_vm9 = vcmp.lt.s32.totalorder %v998_v45, 6 }
   0x8   :  { %v104_v12 = vand.u32 4294901760, %v103_v11  ;;  %489 = vperm.xlu0 %1171, %v485_v9   ;;  %vm1004_vm10 = vmand %vm1000_vm8, %vm1002_vm9 }
   0x9   :  { %v116_v15 = vsub.f32 %v114_v10, %v115_v13  ;;  %v575_v23 = vsub.f32 %v499_v20, %v574_v22  ;;  %v587_v35 = vsub.f32 %v585_v33, %v586_v34 }
   0xa   :  { %v105_v14 = vsub.f32 %v103_v11, %v104_v12 }
   0xb   :  { %v117_v17 = vand.u32 4294901760, %v116_v15  ;;  %v576_v24 = vand.u32 4294901760, %v575_v23  ;;  %v588_v39 = vand.u32 4294901760, %v587_v35 }
   0xc   :  { %v106_v16 = vand.u32 4294901760, %v105_v14 }
   0xd   :  { %v577_v25 = vsub.f32 %v575_v23, %v576_v24 }
   0xe   :  { %1088 = vmatmul.mubr.f32.vlgmr.msra.gmra.mrb[0].mxu0 %v106_v16 }
   0xf   :  { %1091 = vmatpush3.msra.mxu0 %v117_v17  ;;  %1092 = vmatprep.mubr.msk.f32.mxu0 %vm1184_vm2, %v1183_v0  ;;  %v578_v26 = vand.u32 4294901760, %v577_v25 }
  0x10   :  { %1095 = vmatprep.subr.mxu0 %v1183_v0 }
  0x11   :  { %1117 = vmatprep.mubr.f32.mxu1 %v578_v26 }
  0x16   :  { %1093 = vmatmul.mubr.f32.vlgmr.msra.gmra.mrb[0].mxu0 %v102_v8 }
  0x17   :  { %1096 = vmatpush3.msra.mxu0 %v114_v10  ;;  %1097 = vmatprep.mubr.msk.f32.mxu0 %vm1184_vm2, %v1183_v0 }
  0x18   :  { %1100 = vmatprep.subr.mxu0 %v1183_v0 }
  0x1e   :  { %1098 = vmatmul.mubr.f32.vlgmr.msra.gmra.mrb[0].mxu0 %v103_v11 }
  0x1f   :  { %1101 = vmatpush3.msra.mxu0 %v37_v7  ;;  %1102 = vmatprep.mubr.msk.f32.mxu0 %vm1184_vm2, %v1183_v0 }
  0x20   :  { %1105 = vmatprep.subr.mxu0 %v1183_v0 }
  0x26   :  { %1103 = vmatmul.mubr.f32.vlgmr.msra.gmra.mrb[0].mxu0 %v104_v12 }
  0x27   :  { %1106 = vmatpush3.msra.mxu0 %v115_v13  ;;  %1107 = vmatprep.mubr.msk.f32.mxu0 %vm1184_vm2, %v1183_v0 }
  0x28   :  { %1110 = vmatprep.subr.mxu0 %v1183_v0 }
  0x2e   :  { %1108 = vmatmul.mubr.f32.vlgmr.msra.gmra.mrb[0].mxu0 %v102_v8 }
  0x2f   :  { %1111 = vmatpush3.msra.mxu0 %v37_v7  ;;  %1112 = vmatprep.mubr.msk.f32.mxu0 %vm1184_vm2, %v1183_v0 }
  0x36   :  { %1113 = vmatmul.mubr.f32.vlgmr.msra.gmra.mrb[0].mxu0 %v102_v8 }
  0x82   :  { %v495_v46 = vpop.permute.xlu1 %494 }
  0x83   :  { %v26_v29 = vpop.permute.xlu0 %25 }
  0x87   :  { %v490_v48 = vpop.permute.xlu0 %489 }
 0x109   :  { %v478_v30 = vpop.f32.mrb[0].mxu0 }
 0x10a   :  { %v1145_v31 = vadd.f32 %v478_v30, %v26_v29  ;;  %v1114_v32 = vpop.f32.mrb[1].mxu0 }
 0x10c   :  { %1173 = vtanh.f32 %v1145_v31 }
 0x116   :  { %v1174_v36 = vpop.eup %1173 }
 0x117   :  { %v506_v37 = vsel %vm504_vm4, %v1174_v36, 0 }
 0x118   :  { %v509_v38 = vand.u32 4294901760, %v506_v37 }
 0x11a   :  { %1115 = vmatprep.subr.mxu1 %v509_v38  ;;  %v596_v40 = vsub.f32 %v506_v37, %v509_v38 }
 0x11b   :  { %1116 = vmatpush3.msra.mxu1 %v509_v38 }
 0x11c   :  { %1118 = vmatmul.mubr.f32.vlgmr.msra.gmra.mrb[0].mxu1 %v588_v39  ;;  %v597_v41 = vand.u32 4294901760, %v596_v40 }
 0x11d   :  { %1122 = vmatprep.mubr.f32.mxu1 %v574_v22 }
 0x11e   :  { %v598_v42 = vsub.f32 %v596_v40, %v597_v41 }
 0x120   :  { %v599_v43 = vand.u32 4294901760, %v598_v42 }
 0x122   :  { %1120 = vmatprep.subr.mxu1 %v599_v43 }
 0x123   :  { %1121 = vmatpush3.msra.mxu1 %v599_v43 }
 0x124   :  { %1123 = vmatmul.mubr.f32.vlgmr.msra.gmra.mrb[0].mxu1 %v584_v28  ;;  %1125 = vmatprep.subr.mxu1 %v596_v40 }
 0x125   :  { %1126 = vmatpush3.msra.mxu1 %v596_v40  ;;  %1127 = vmatprep.mubr.f32.mxu1 %v575_v23 }
 0x126   :  { %1130 = vmatprep.subr.mxu1 %v509_v38 }
 0x12c   :  { %1128 = vmatmul.mubr.f32.vlgmr.msra.gmra.mrb[0].mxu1 %v585_v33 }
 0x12d   :  { %1131 = vmatpush3.msra.mxu1 %v509_v38  ;;  %1132 = vmatprep.mubr.f32.mxu1 %v576_v24 }
 0x12e   :  { %1135 = vmatprep.subr.mxu1 %v597_v41 }
 0x134   :  { %1133 = vmatmul.mubr.f32.vlgmr.msra.gmra.mrb[0].mxu1 %v586_v34 }
 0x135   :  { %1136 = vmatpush3.msra.mxu1 %v597_v41  ;;  %1137 = vmatprep.mubr.f32.mxu1 %v574_v22 }
 0x136   :  { %1140 = vmatprep.subr.mxu1 %v509_v38 }
 0x13c   :  { %1138 = vmatmul.mubr.f32.vlgmr.msra.gmra.mrb[0].mxu1 %v584_v28 }
 0x13d   :  { %1141 = vmatpush3.msra.mxu1 %v509_v38  ;;  %1142 = vmatprep.mubr.f32.mxu1 %v574_v22 }
 0x144   :  { %1143 = vmatmul.mubr.f32.vlgmr.msra.gmra.mrb[0].mxu1 %v584_v28 }
 0x217   :  { %v1144_v47 = vpop.f32.mrb[0].mxu1 }
 0x218   :  { %v1146_v49 = vadd.f32 %v1144_v47, %v495_v46  ;;  %v987_v50 = vpop.f32.mrb[1].mxu1 }
 0x219   :  { %v1147_v51 = vadd.f32 %v987_v50, %v490_v48 }
 0x21a   :  { %v1013_v53 = vsel %vm1012_vm6, %v1146_v49, -inf }
 0x21b   :  { %v1008_v52 = vsel %vm1006_vm5, %v1147_v51, -inf  ;;  %v1041_v12 = vmul.f32 1.442695, %v1147_v51 }
 0x21c   :  { %v1011_v54 = vsel %vm1010_vm7, %v1008_v52, -inf }
 0x21d   :  { %v1014_v55 = vmax.f32 %v1011_v54, %v1013_v53 }
 0x21f   :  { %v1015_v56 = vrot.slane %v1014_v55, 4 }
 0x221   :  { %v1016_v57 = vmax.f32 %v1014_v55, %v1015_v56 }
 0x223   :  { %v1017_v58 = vrot.slane %v1016_v57, 2 }
 0x225   :  { %v1018_v59 = vmax.f32 %v1016_v57, %v1017_v58 }
 0x227   :  { %v1019_v60 = vrot.slane %v1018_v59, 1 }
 0x229   :  { %v1020_v61 = vmax.f32 %v1018_v59, %v1019_v60 }
 0x22b   :  { %v1021_v62 = vsub.f32 %v1147_v51, %v1020_v61  ;;  %v1022_v63 = vsub.f32 %v1146_v49, %v1020_v61 }
 0x22d   :  { %v1023_v0 = vmul.f32 1.442695, %v1021_v62  ;;  %v1025_v1 = vmul.f32 1.442695, %v1022_v63 }
 0x22f   :  { %1175 = vpow2.f32 %v1023_v0 }
 0x230   :  { %1177 = vpow2.f32 %v1025_v1 }
 0x231   :  { %1179 = vpow2.f32 %v1041_v12 }
 0x239   :  { %v1176_v2 = vpop.eup %1175 }
 0x23a   :  { %v1178_v3 = vpop.eup %1177  ;;  %v1027_v4 = vsel %vm1006_vm5, %v1176_v2, 0.0 }
 0x23b   :  { %v1029_v5 = vsel %vm1010_vm7, %v1027_v4, 0.0  ;;  %v1030_v6 = vsel %vm1012_vm6, %v1178_v3, 0.0  ;;  %v1180_v15 = vpop.eup %1179 }
 0x23c   :  { %v1031_v7 = vadd.f32 %v1030_v6, %v1029_v5  ;;  %v1045_v19 = vsel %vm1004_vm10, %v1180_v15, %v1147_v51 }
 0x23e   :  { %v1032_v8 = vrot.slane %v1031_v7, 4 }
 0x240   :  { %v1033_v9 = vadd.f32 %v1032_v8, %v1031_v7 }
 0x242   :  { %v1034_v10 = vrot.slane %v1033_v9, 2 }
 0x244   :  { %v1035_v11 = vadd.f32 %v1034_v10, %v1033_v9 }
 0x246   :  { %v1036_v13 = vrot.slane %v1035_v11, 1 }
 0x248   :  { %v1037_v14 = vadd.f32 %v1036_v13, %v1035_v11 }
 0x24a   :  { %1181 = vrcp.f32 %v1037_v14 }
 0x254   :  { %v1182_v16 = vpop.eup %1181 }
 0x255   :  { %v1039_v17 = vmul.f32 %v1182_v16, %v1027_v4  ;;  %v1040_v18 = vmul.f32 %v1182_v16, %v1178_v3 }
 0x257   :  { %v1047_v20 = vsel %vm1006_vm5, %v1039_v17, %v1045_v19  ;;  %1050 = vst.msk [vmem:[%s1263_s5 + $0x8] sm:$0x1] %vm1012_vm6, %v1040_v18 }
 0x258   :  { %1049 = vst.msk [vmem:[%s1263_s5] sm:$0xff] %vm1010_vm7, %v1047_v20 }

</bundles_post_ra>
